<compile_context>
chip_gen: v6e
topology: v6e:2x2x1
jax: 0.10.0
libtpu: 0.0.40
codegen_flags: <defaults>
</compile_context>

<pallas_src>
import math

import jax
import jax.numpy as jnp
from jax.experimental import pallas as pl
from jax.experimental.pallas import tpu as pltpu


def _build_pe(max_len: int, dimension: int, dtype=jnp.float32) -> jnp.ndarray:
    """Deterministic construction of the positional-encoding buffer (plain JAX, done once)."""
    position = jnp.arange(max_len, 0, -1, dtype=jnp.float32)[:, None]       # (max_len, 1), descending
    div_term = jnp.exp(
        jnp.arange(0, dimension, 2, dtype=jnp.float32)
        * (-math.log(10000.0) / dimension)
    )                                                                        # (dimension//2,)
    pe = jnp.zeros((max_len, dimension), dtype=jnp.float32)
    pe = pe.at[:, 0::2].set(jnp.sin(position * div_term))
    pe = pe.at[:, 1::2].set(jnp.cos(position * div_term))
    return pe.astype(dtype)                                                  # (max_len, dimension)


def _add_pe_kernel(x_ref, pe_ref, o_ref):
    # x_ref: (tb, td) VMEM tile; pe_ref: (1, td) VMEM-resident row; broadcast add on the VPU.
    o_ref[...] = x_ref[...] + pe_ref[...]


def _round_up(a: int, m: int) -> int:
    return ((a + m - 1) // m) * m


_TINY_BYTES = 128 * 1024          # below this, fused XLA beats Pallas launch/DMA overhead
_VMEM_BUDGET = 8 * 1024 * 1024    # target peak pipeline scratch (v5e scoped default = 16 MiB)


def positional_encoding_forward(x: jnp.ndarray, pe: jnp.ndarray, time_step,
                                *, force_pallas: bool = False) -> jnp.ndarray:
    """x: (batch, dimension); pe: (max_len, dimension); returns x + pe[time_step]."""
    B, D = x.shape
    max_len, Dp = pe.shape
    assert D == Dp

    # --- Row selection in the wrapper (no scalar-prefetch machinery needed). ---
    if isinstance(time_step, int):
        ts = min(max(int(time_step), 0), max_len - 1)                 # static clamp
        row = pe[ts:ts + 1]                                           # (1, D)
    else:
        ts = jnp.clip(jnp.asarray(time_step, jnp.int32), 0, max_len - 1)
        row = jax.lax.dynamic_slice_in_dim(pe, ts, 1, axis=0)         # (1, D)
    if row.dtype != x.dtype:
        row = row.astype(x.dtype)

    itemsize = jnp.dtype(x.dtype).itemsize

    # --- Tiny inputs: skip Pallas entirely, let XLA fuse the broadcast add. ---
    if not force_pallas and B * D * itemsize <= _TINY_BYTES:
        return x + row

    # --- Lane-dense guard: pad trailing dim to a multiple of 128 (unmasked vst). ---
    D_pad = _round_up(D, 128)
    if D_pad != D:
        x_p = jnp.pad(x, ((0, 0), (0, D_pad - D)))
        row_p = jnp.pad(row, ((0, 0), (0, D_pad - D)))
    else:
        x_p, row_p = x, row

    # Sublane packing factor: 8 (f32), 16 (bf16), 32 (int8/fp8).
    packing = max(8, 32 // itemsize)

    # Peak pipeline scratch ~= 2*(x tile) + 2*(out tile) = 4 * tb * td * itemsize
    # (the double-buffered (1, td) pe row is negligible).
    td = D_pad
    if 4 * packing * td * itemsize > _VMEM_BUDGET:
        # Very wide D: tile the lane axis too, keeping it a multiple of 128.
        td = max(128, (_VMEM_BUDGET // (4 * packing * itemsize)) // 128 * 128)

    tb_cap = max(packing, (_VMEM_BUDGET // (4 * td * itemsize)) // packing * packing)
    if B < 256 and 4 * B * td * itemsize <= _VMEM_BUDGET:
        # Small batch: single full-dim row block (full-array dims exempt from the 8-row rule).
        tb = B
    else:
        # 512-row tiles already hit ~85% of HBM roofline; don't go bigger.
        tb = min(512, tb_cap)
        # Guarantee >= 2 row-grid steps so the "parallel" axis can shard across v7x's 2 TCs.
        tb = min(tb, _round_up(pl.cdiv(B, 2), packing))
        tb = max(packing, tb)
    if td < D_pad and tb % packing != 0:
        tb = _round_up(tb, packing)    # keep sublane-divisible when the lane axis is tiled

    grid = (pl.cdiv(B, tb), pl.cdiv(D_pad, td))

    grid_spec = pl.GridSpec(
        grid=grid,
        in_specs=[
            pl.BlockSpec((tb, td), lambda i, j: (i, j)),   # row/col tile of x
            pl.BlockSpec((1, td), lambda i, j: (0, j)),    # pe row: constant row-block, VMEM-resident
        ],
        out_specs=pl.BlockSpec((tb, td), lambda i, j: (i, j)),
    )

    cost = pl.CostEstimate(
        flops=B * D,
        transcendentals=0,
        bytes_accessed=(2 * B * D + D) * itemsize,
    )

    out = pl.pallas_call(
        _add_pe_kernel,
        out_shape=jax.ShapeDtypeStruct((B, D_pad), x.dtype),
        grid_spec=grid_spec,
        compiler_params=pltpu.CompilerParams(
            # Row tiles are independent -> megacore (v7x) splits axis 0; lane sweep stays
            # sequential per core for contiguous HBM traffic.
            dimension_semantics=("parallel", "arbitrary"),
        ),
        cost_estimate=cost,
    )(x_p, row_p)

    if D_pad != D:
        out = out[:, :D]
    return out


if __name__ == "__main__":
    # Module defaults: dimension=256, max_len=50.
    dimension, max_len = 256, 50
    key = jax.random.PRNGKey(0)
    k1, k2 = jax.random.split(key)

    pe = _build_pe(max_len, dimension)

    # 1) Pipelined Pallas path: 256 rows -> two 128-row tiles (megacore-friendly grid=(2,1)).
    batch, time_step = 256, 7
    x = jax.random.normal(k1, (batch, dimension), dtype=jnp.float32)
    out = jax.block_until_ready(positional_encoding_forward(x, pe, time_step))
    ref = x + pe[time_step][None, :]
    assert out.shape == x.shape and out.dtype == x.dtype
    assert jnp.allclose(out, ref, atol=1e-6, rtol=1e-6)

    # 2) Tiny batch forced through the Pallas single-block path.
    x_small = jax.random.normal(k2, (4, dimension), dtype=jnp.float32)
    out_s = jax.block_until_ready(
        positional_encoding_forward(x_small, pe, 2, force_pallas=True))
    assert jnp.allclose(out_s, x_small + pe[2][None, :], atol=1e-6, rtol=1e-6)

    # 3) Tiny batch via the auto (fused XLA) path with a traced time_step.
    out_a = jax.block_until_ready(
        jax.jit(lambda xv, t: positional_encoding_forward(xv, pe, t))(
            x_small, jnp.int32(5)))
    assert jnp.allclose(out_a, x_small + pe[5][None, :], atol=1e-6, rtol=1e-6)

    print("KERNEL_OK")
</pallas_src>

<mosaic_0001>
module attributes {stable_mosaic.version = 11 : i64} {
  func.func @_add_pe_kernel(%arg0: i32, %arg1: i32, %arg2: memref<128x256xf32, #tpu.memory_space<vmem>>, %arg3: memref<1x256xf32, #tpu.memory_space<vmem>>, %arg4: memref<128x256xf32, #tpu.memory_space<vmem>>) attributes {dimension_semantics = [#tpu.dimension_semantics<parallel>, #tpu.dimension_semantics<arbitrary>], iteration_bounds = array<i64: 2, 1>, scalar_prefetch = 0 : i64, scratch_operands = 0 : i64, tpu.core_type = #tpu.core_type<tc>, window_params = [{transform_indices = @transform_0, window_bounds = array<i64: 128, 256>}, {transform_indices = @transform_1, window_bounds = array<i64: 1, 256>}, {transform_indices = @transform_2, window_bounds = array<i64: 128, 256>}]} {
    %c0 = arith.constant 0 : index
    %c0_0 = arith.constant 0 : index
    %0 = vector.load %arg2[%c0, %c0_0] : memref<128x256xf32, #tpu.memory_space<vmem>>, vector<128x256xf32>
    %c0_1 = arith.constant 0 : index
    %c0_2 = arith.constant 0 : index
    %1 = vector.load %arg3[%c0_1, %c0_2] : memref<1x256xf32, #tpu.memory_space<vmem>>, vector<1x256xf32>
    %2 = vector.broadcast %1 : vector<1x256xf32> to vector<128x256xf32>
    %3 = arith.addf %0, %2 : vector<128x256xf32>
    %c0_3 = arith.constant 0 : index
    %c0_4 = arith.constant 0 : index
    %4 = vector.load %arg4[%c0_3, %c0_4] : memref<128x256xf32, #tpu.memory_space<vmem>>, vector<128x256xf32>
    tpu.vector_store %arg4[%c0_3, %c0_4], %3 {strides = array<i32>} : memref<128x256xf32, #tpu.memory_space<vmem>>, vector<128x256xf32>,
    return
  }
  func.func @transform_0(%arg0: i32, %arg1: i32) -> (i32, i32) {
    %c0_i32 = arith.constant 0 : i32
    return %arg0, %arg1 : i32, i32
  }
  func.func @transform_1(%arg0: i32, %arg1: i32) -> (i32, i32) {
    %c0_i32 = arith.constant 0 : i32
    %c0_i32_0 = arith.constant 0 : i32
    return %c0_i32, %arg1 : i32, i32
  }
  func.func @transform_2(%arg0: i32, %arg1: i32) -> (i32, i32) {
    %c0_i32 = arith.constant 0 : i32
    return %arg0, %arg1 : i32, i32
  }
}

</mosaic_0001>

<bundles_post_ra>
// kernel: tpu_custom_call.1
= control target key start
LH: loop header
LB: loop body
LE: loop exit
PB: predicated region body
PF: predicated region fallthrough
CT: control target
= control target key end

     0   :  { %7 = vsyncpa [#allocation3], 0  ;;  %s983_s0 = inlined_call_operand.hbm [shape: f32[256,256], index: 0, kind: input, shape index: {}]   ;;  %s984_s1 = inlined_call_operand.hbm [shape: f32[1,256], index: 1, kind: input, shape index: {}]   ;;  %s985_s2 = inlined_call_operand.hbm [shape: f32[256,256], index: 2, kind: output, shape index: {}]  }
   0x1   :  { %9 = vsyncpa [#allocation3 + $0x1], 0 }
   0x2   :  { %10 = vsyncpa [#allocation6], 0 }
   0x3   :  { %11 = vsyncpa [#allocation4], 0 }
   0x4   :  { %13 = vsyncpa [#allocation4 + $0x1], 0  ;;  %s693_s9 = smov 0   ;;  %s695_s10 = smov 0  }
   0x5   :  { %s697_s11 = smov 0   ;;  %s699_s12 = smov 0  }
   0x6   :  { %s701_s13 = smov 0   ;;  %s703_s14 = smov 0  }
   0x7 LB: > { %s431_s15 = sadd.s32 4294967295, %s669_s14   ;;  %s432_s16 = sadd.s32 4294967294, %s669_s14   ;;  %s669_s14 = sphi %s703_s14, %s19_s14   ;;  %s665_s13 = sphi %s701_s13, %s1004_s13   ;;  %s661_s12 = sphi %s699_s12, %s1003_s12   ;;  %s657_s11 = sphi %s697_s11, %s1002_s11   ;;  %s653_s10 = sphi %s695_s10, %s1001_s10   ;;  %s649_s9 = sphi %s693_s9, %s1000_s9  }
   0x8   : > { %s40_s17 = sadd.s32 1, %s657_s11  ;;  %p47_p0 = scmp.ne.s32.totalorder %s657_s11, %s653_s10 }
   0x9   : > { %p48_p1 = scmp.eq.s32.totalorder %s669_s14, 0  ;;  %p53_p2 = scmp.ne.s32.totalorder %s653_s10, %s649_s9 }
   0xa   : > { %p731_p3 = scmp.eq.s32.totalorder %s431_s15, 0  ;;  %p105_p4 = scmp.eq.s32.totalorder %s431_s15, 1 }
   0xb   : > { %p735_p5 = por %p48_p1, %p47_p0  ;;  %p111_p6 = scmp.eq.s32.totalorder %s432_s16, 1 }
   0xc   : > { %p741_p7 = por %p731_p3, %p53_p2  ;;  %p745_p8 = por %p105_p4, %p47_p0 }
   0xd   : > { %p749_p9 = por %p111_p6, %p53_p2  ;;  %p433_p10 = scmp.ge.s32.totalorder %s669_s14, 1 }
   0xe   : > { %s990_s20 = scalar_select %p741_p7, 1, 0 }
   0xf   : > { %s991_s21 = scalar_select %p745_p8, 1, 0 }
  0x10   : > { %s992_s22 = scalar_select %p749_p9, 1, 0 }
  0x11   : > { %p118_p11 = scmp.lt.s32.totalorder %s669_s14, 3  ;;  %s671_s24 = smov [#allocation5]  }
  0x12   : > { %s134_s25 = sshll.u32 %s671_s24, 4  ;;  %p475_p1 = scmp.lt.s32.totalorder %s669_s14, 2  ;;  %s135_s25 = int_to_ptr.vmem [resolvable:$true] %s134_s25 }
  0x13   : > { %p756_p13 = pnand %p433_p10, %p118_p11  ;;  %s31_s28 = sadd.s32 1, %s665_s13 }
  0x14   : > { %p765_p4 = pnand %p475_p1, %p735_p5  ;;  %p33_p6 = scmp.ge.s32.totalorder %s31_s28, 2 }
  0x15   : > { %p462_p0 = pneg %p756_p13  ;;  %s145_s29 = sand.u32 1, %s657_s11  }
  0x16   : > { %s542_s30 = scalar_lea.vmem %s135_s25, 32  ;;  %p550_p8 = scmp.lt.s32.totalorder %s135_s25, %s135_s25 }
  0x17   : > { %p771_p2 = pnand %p462_p0, %p731_p3  ;;  %p543_p11 = scmp.ne.s32.totalorder %s135_s25, %s542_s30 }
  0x18   : > { %p551_p5 = scmp.lt.s32.totalorder %s542_s30, %s542_s30 }
  0x19   : > { %p533_p10 = pneg %p771_p2 }
  0x1a   : > { %p552_p1 = por %p551_p5, %p550_p8 }
  0x1b   : > { %p545_p12 = pnand %p543_p11, %p533_p10 }
  0x1d   : > { %p546_p9 = pneg %p545_p12 }
  0x1f   : > { %p553_p7 = pnand %p552_p1, %p546_p9 }
  0x21   : > { %556 = shalt.err (!%p553_p7)
}
  0x22   : > { %465 = dma.hbm_to_vmem [thread:$0]  (!%p771_p2), %s984_s1, 32, %s135_s25, [#allocation6]  }
  0x23   : > { %s1006_s28 = smov (%p33_p6, %s31_s28), 0  ;;  %s436_s5 = sshll.u32 %s145_s29, 8 }
  0x24   : > { %s35_s6 = ssub.s32 %s665_s13, %s1006_s28  ;;  %s451_s7 = sshll.u32 %s665_s13, 12 }
  0x25   : > { %p38_p12 = scmp.eq.s32.totalorder %s35_s6, 0  ;;  %s158_s16 = scalar_lea.hbm %s983_s0, %s451_s7 }
  0x26   : > { %s149_s19 = scalar_lea.vmem [#allocation2], %s436_s5  ;;  %s146_s30 = scalar_lea.sflag [#allocation3], %s145_s29 }
  0x27   : > { %s159_s24 = sshll.u32 %s149_s19, 4  ;;  %p559_p7 = pneg %p765_p4  ;;  %s160_s24 = int_to_ptr.vmem [resolvable:$true] %s159_s24 }
  0x28   : > { %s795_s27 = scalar_select %p38_p12, %s657_s11, %s40_s17  }
  0x29   : > { %s570_s25 = scalar_lea.vmem %s160_s24, 4096  ;;  %s672_s3 = smov [#allocation2]  }
  0x2a   : > { %p571_p8 = scmp.ne.s32.totalorder %s160_s24, %s570_s25  ;;  %s575_s4 = sshll.u32 %s672_s3, 4  ;;  %s576_s4 = int_to_ptr.vmem [resolvable:$false] %s575_s4 }
  0x2b   : > { %s577_s6 = scalar_lea.vmem %s576_s4, 8192  ;;  %p578_p2 = scmp.lt.s32.totalorder %s160_s24, %s576_s4 }
  0x2c   : > { %p573_p9 = pnand %p571_p8, %p559_p7  ;;  %p579_p6 = scmp.lt.s32.totalorder %s577_s6, %s570_s25 }
  0x2e   : > { %p574_p0 = pneg %p573_p9  ;;  %p580_p10 = por %p579_p6, %p578_p2 }
  0x30   : > { %p581_p11 = pnand %p580_p10, %p574_p0 }
  0x32   : > { %584 = shalt.err (!%p581_p11)
}
  0x33   : > { %s673_s5 = smov 256   ;;  %s674_s17 = smov 16  }
  0x34   : > { %469 = dma.hbm_to_vmem [thread:$0]  (!%p765_p4), %s158_s16, 4096, %s160_s24, %s146_s30, %s673_s5, %s673_s5, %s674_s17  }
  0x35   : > { %171 = sbr.rel (%p756_p13) target bundleno = 100 (0x64), region = 28  ;;  %s804_s29 = sand.u32 (!%p756_p13), 1, %s653_s10  }
  0x36   : > { %s441_s7 = sshll.u32 (!%p756_p13), %s804_s29, 8  ;;  %s174_s8 = scalar_lea.sflag (!%p756_p13), [#allocation3], %s804_s29 }
  0x37   : > { %s810_s15 = scalar_lea.vmem (!%p756_p13), [#allocation2], %s441_s7  ;;  %p996_p5 = scmp.ne.s32.totalorder (!%p756_p13), %s990_s20, 0 }
  0x3a   : > { %636 = dma.done.wait (%p996_p5), %s174_s8, 4096  }
  0x3b   : > { %638 = vsyncadd (%p996_p5), %s174_s8, 4294963200 }
  0x3c   : > { %640 = dma.done.wait (%p731_p3), [#allocation6], 32  }
  0x3d   : > { %642 = vsyncadd (%p731_p3), [#allocation6], 4294967264  ;;  %v241_v0 = vlaneseq  ;;  %v207_v4 = vld [vmem:[%s810_s15] sm:$0xff]  ;;  %v208_v6 = vld [vmem:[%s810_s15 + $0x8] sm:$0xff]  ;;  %s848_s18 = scalar_lea.vmem [#allocation7], %s441_s7  ;;  %s453_s20 = sshll.u32 %s661_s12, 12 }
  0x3e   : > { %v239_v5 = vld [vmem:[#allocation5] sm:$0x3]  ;;  %v209_v9 = vld [vmem:[%s810_s15 + $0x10] sm:$0xff]  ;;  %v210_v10 = vld [vmem:[%s810_s15 + $0x18] sm:$0xff]  ;;  %s332_s23 = sshll.u32 %s848_s18, 4  ;;  %s919_s19 = scalar_lea.hbm %s985_s2, %s453_s20  ;;  %s923_s23 = int_to_ptr.vmem [resolvable:$true] %s332_s23 }
  0x3f   : > { %v242_v1 = vshrl.u32 %v241_v0, 7  ;;  %v211_v11 = vld [vmem:[%s810_s15 + $0x20] sm:$0xff]  ;;  %v212_v12 = vld [vmem:[%s810_s15 + $0x28] sm:$0xff]  ;;  %v213_v13 = vld [vmem:[%s810_s15 + $0x30] sm:$0xff]  ;;  %s316_s12 = scalar_lea.sflag [#allocation4], %s804_s29  ;;  %s585_s24 = scalar_lea.vmem %s923_s23, 4096 }
  0x40   : > { %v214_v14 = vld [vmem:[%s810_s15 + $0x38] sm:$0xff]  ;;  %v215_v19 = vld [vmem:[%s810_s15 + $0x40] sm:$0xff]  ;;  %v216_v20 = vld [vmem:[%s810_s15 + $0x48] sm:$0xff]  ;;  %p586_p3 = scmp.ne.s32.totalorder %s923_s23, %s585_s24  ;;  %p997_p13 = scmp.ne.s32.totalorder %s991_s21, 0 }
  0x41   : > { %v243_v2 = vsub.s32 0, %v242_v1  ;;  %v247_v3 = vsub.s32 1, %v242_v1  ;;  %v217_v21 = vld [vmem:[%s810_s15 + $0x50] sm:$0xff]  ;;  %v218_v26 = vld [vmem:[%s810_s15 + $0x58] sm:$0xff]  ;;  %v219_v27 = vld [vmem:[%s810_s15 + $0x60] sm:$0xff]  ;;  %s675_s30 = smov [#allocation7]  }
  0x42   : > { %v220_v28 = vld [vmem:[%s810_s15 + $0x68] sm:$0xff]  ;;  %v221_v33 = vld [vmem:[%s810_s15 + $0x70] sm:$0xff]  ;;  %v222_v34 = vld [vmem:[%s810_s15 + $0x78] sm:$0xff]  ;;  %p587_p4 = pnand %p586_p3, %p997_p13  ;;  %s589_s25 = sshll.u32 %s675_s30, 4  ;;  %s590_s25 = int_to_ptr.vmem [resolvable:$false] %s589_s25 }
  0x43   : > { %v822_v7 = vrot.slane %v239_v5, %v243_v2  ;;  %v824_v8 = vrot.slane %v239_v5, %v247_v3  ;;  %v223_v35 = vld [vmem:[%s810_s15 + $0x80] sm:$0xff]  ;;  %v224_v40 = vld [vmem:[%s810_s15 + $0x88] sm:$0xff]  ;;  %v225_v41 = vld [vmem:[%s810_s15 + $0x90] sm:$0xff]  ;;  %s591_s3 = scalar_lea.vmem %s590_s25, 8192  ;;  %p592_p12 = scmp.lt.s32.totalorder %s923_s23, %s590_s25 }
  0x44   : > { %v226_v42 = vld [vmem:[%s810_s15 + $0x98] sm:$0xff]  ;;  %v227_v47 = vld [vmem:[%s810_s15 + $0xa0] sm:$0xff]  ;;  %v228_v48 = vld [vmem:[%s810_s15 + $0xa8] sm:$0xff]  ;;  %p588_p1 = pneg %p587_p4  ;;  %p593_p7 = scmp.lt.s32.totalorder %s591_s3, %s585_s24 }
  0x45   : > { %v251_v15 = vadd.f32 %v822_v7, %v207_v4  ;;  %v252_v16 = vadd.f32 %v824_v8, %v208_v6  ;;  %v253_v17 = vadd.f32 %v822_v7, %v209_v9  ;;  %v254_v18 = vadd.f32 %v824_v8, %v210_v10  ;;  %v229_v49 = vld [vmem:[%s810_s15 + $0xb0] sm:$0xff]  ;;  %v230_v53 = vld [vmem:[%s810_s15 + $0xb8] sm:$0xff]  ;;  %v231_v54 = vld [vmem:[%s810_s15 + $0xc0] sm:$0xff] }
  0x46   : > { %v255_v22 = vadd.f32 %v822_v7, %v211_v11  ;;  %v256_v23 = vadd.f32 %v824_v8, %v212_v12  ;;  %v257_v24 = vadd.f32 %v822_v7, %v213_v13  ;;  %v258_v25 = vadd.f32 %v824_v8, %v214_v14  ;;  %v232_v55 = vld [vmem:[%s810_s15 + $0xc8] sm:$0xff]  ;;  %v233_v59 = vld [vmem:[%s810_s15 + $0xd0] sm:$0xff]  ;;  %v234_v60 = vld [vmem:[%s810_s15 + $0xd8] sm:$0xff]  ;;  %p594_p8 = por %p593_p7, %p592_p12 }
  0x47   : > { %283 = vst [vmem:[%s848_s18] sm:$0xff] %v251_v15  ;;  %284 = vst [vmem:[%s848_s18 + $0x8] sm:$0xff] %v252_v16  ;;  %v259_v29 = vadd.f32 %v822_v7, %v215_v19  ;;  %v260_v30 = vadd.f32 %v824_v8, %v216_v20  ;;  %v261_v31 = vadd.f32 %v822_v7, %v217_v21  ;;  %v235_v61 = vld [vmem:[%s810_s15 + $0xe0] sm:$0xff]  ;;  %v236_v1 = vld [vmem:[%s810_s15 + $0xe8] sm:$0xff] }
  0x48   : > { %285 = vst [vmem:[%s848_s18 + $0x10] sm:$0xff] %v253_v17  ;;  %286 = vst [vmem:[%s848_s18 + $0x18] sm:$0xff] %v254_v18  ;;  %v262_v32 = vadd.f32 %v824_v8, %v218_v26  ;;  %v263_v36 = vadd.f32 %v822_v7, %v219_v27  ;;  %v264_v37 = vadd.f32 %v824_v8, %v220_v28  ;;  %v237_v2 = vld [vmem:[%s810_s15 + $0xf0] sm:$0xff]  ;;  %v238_v3 = vld [vmem:[%s810_s15 + $0xf8] sm:$0xff]  ;;  %p595_p9 = pnand %p594_p8, %p588_p1 }
  0x49   : > { %287 = vst [vmem:[%s848_s18 + $0x20] sm:$0xff] %v255_v22  ;;  %288 = vst [vmem:[%s848_s18 + $0x28] sm:$0xff] %v256_v23  ;;  %v265_v38 = vadd.f32 %v822_v7, %v221_v33  ;;  %v266_v39 = vadd.f32 %v824_v8, %v222_v34  ;;  %v267_v43 = vadd.f32 %v822_v7, %v223_v35 }
  0x4a   : > { %289 = vst [vmem:[%s848_s18 + $0x30] sm:$0xff] %v257_v24  ;;  %290 = vst [vmem:[%s848_s18 + $0x38] sm:$0xff] %v258_v25  ;;  %v268_v44 = vadd.f32 %v824_v8, %v224_v40  ;;  %v269_v45 = vadd.f32 %v822_v7, %v225_v41  ;;  %v270_v46 = vadd.f32 %v824_v8, %v226_v42 }
  0x4b   : > { %291 = vst [vmem:[%s848_s18 + $0x40] sm:$0xff] %v259_v29  ;;  %292 = vst [vmem:[%s848_s18 + $0x48] sm:$0xff] %v260_v30  ;;  %v271_v50 = vadd.f32 %v822_v7, %v227_v47  ;;  %v272_v51 = vadd.f32 %v824_v8, %v228_v48  ;;  %v273_v52 = vadd.f32 %v822_v7, %v229_v49 }
  0x4c   : > { %293 = vst [vmem:[%s848_s18 + $0x50] sm:$0xff] %v261_v31  ;;  %294 = vst [vmem:[%s848_s18 + $0x58] sm:$0xff] %v262_v32  ;;  %v274_v56 = vadd.f32 %v824_v8, %v230_v53  ;;  %v275_v57 = vadd.f32 %v822_v7, %v231_v54  ;;  %v276_v58 = vadd.f32 %v824_v8, %v232_v55 }
  0x4d   : > { %295 = vst [vmem:[%s848_s18 + $0x60] sm:$0xff] %v263_v36  ;;  %296 = vst [vmem:[%s848_s18 + $0x68] sm:$0xff] %v264_v37  ;;  %v277_v62 = vadd.f32 %v822_v7, %v233_v59  ;;  %v278_v63 = vadd.f32 %v824_v8, %v234_v60  ;;  %v279_v0 = vadd.f32 %v822_v7, %v235_v61 }
  0x4e   : > { %297 = vst [vmem:[%s848_s18 + $0x70] sm:$0xff] %v265_v38  ;;  %298 = vst [vmem:[%s848_s18 + $0x78] sm:$0xff] %v266_v39  ;;  %v280_v4 = vadd.f32 %v824_v8, %v236_v1  ;;  %v281_v5 = vadd.f32 %v822_v7, %v237_v2  ;;  %v282_v6 = vadd.f32 %v824_v8, %v238_v3 }
  0x4f   : > { %299 = vst [vmem:[%s848_s18 + $0x80] sm:$0xff] %v267_v43  ;;  %300 = vst [vmem:[%s848_s18 + $0x88] sm:$0xff] %v268_v44 }
  0x50   : > { %301 = vst [vmem:[%s848_s18 + $0x90] sm:$0xff] %v269_v45  ;;  %302 = vst [vmem:[%s848_s18 + $0x98] sm:$0xff] %v270_v46 }
  0x51   : > { %303 = vst [vmem:[%s848_s18 + $0xa0] sm:$0xff] %v271_v50  ;;  %304 = vst [vmem:[%s848_s18 + $0xa8] sm:$0xff] %v272_v51 }
  0x52   : > { %305 = vst [vmem:[%s848_s18 + $0xb0] sm:$0xff] %v273_v52  ;;  %306 = vst [vmem:[%s848_s18 + $0xb8] sm:$0xff] %v274_v56 }
  0x53   : > { %307 = vst [vmem:[%s848_s18 + $0xc0] sm:$0xff] %v275_v57  ;;  %308 = vst [vmem:[%s848_s18 + $0xc8] sm:$0xff] %v276_v58 }
  0x54   : > { %309 = vst [vmem:[%s848_s18 + $0xd0] sm:$0xff] %v277_v62  ;;  %310 = vst [vmem:[%s848_s18 + $0xd8] sm:$0xff] %v278_v63 }
  0x55   : > { %311 = vst [vmem:[%s848_s18 + $0xe0] sm:$0xff] %v279_v0  ;;  %312 = vst [vmem:[%s848_s18 + $0xe8] sm:$0xff] %v280_v4 }
  0x56   : > { %313 = vst [vmem:[%s848_s18 + $0xf0] sm:$0xff] %v281_v5  ;;  %314 = vst [vmem:[%s848_s18 + $0xf8] sm:$0xff] %v282_v6 }
  0x57   : > { %598 = shalt.err (!%p595_p9)
}
  0x58   : > { %s599_s4 = scalar_lea.hbm %s919_s19, 4096  ;;  %s603_s17 = scalar_lea.hbm %s985_s2, 8192 }
  0x59   : > { %p600_p0 = scmp.ne.s32.totalorder %s919_s19, %s599_s4  ;;  %p604_p10 = scmp.lt.s32.totalorder %s919_s19, %s985_s2 }
  0x5a   : > { %p605_p11 = scmp.lt.s32.totalorder %s603_s17, %s599_s4 }
  0x5b   : > { %p601_p2 = pnand %p600_p0, %p997_p13 }
  0x5c   : > { %p606_p5 = por %p605_p11, %p604_p10 }
  0x5d   : > { %p602_p6 = pneg %p601_p2 }
  0x5f   : > { %p607_p3 = pnand %p606_p5, %p602_p6 }
  0x61   : > { %610 = shalt.err (!%p607_p3)
}
  0x62   : > { %s676_s15 = smov 256   ;;  %s677_s18 = smov 16  }
  0x63   : > { %460 = dma.vmem_to_hbm [thread:$0]  (%p997_p13), %s923_s23, 4096, %s919_s19, %s316_s12, %s676_s15, %s676_s15, %s677_s18  }
  0x64 PF: > { %s347_s20 = sand.u32 1, %s649_s9   ;;  %p998_p4 = scmp.ne.s32.totalorder %s992_s22, 0 }
  0x65   : > { %p999_p1 = scmp.ge.s32.totalorder %s669_s14, 2  ;;  %s348_s26 = scalar_lea.sflag [#allocation4], %s347_s20 }
  0x67   : > { %p471_p12 = pnand %p999_p1, %p998_p4 }
  0x69   : > { %p472_p7 = pneg %p471_p12 }
  0x6b   : > { %644 = dma.done.wait (%p472_p7), %s348_s26, 4096  }
  0x6c   : > { %646 = vsyncadd (%p472_p7), %s348_s26, 4294963200  ;;  %s19_s14 = sadd.s32 1, %s669_s14   ;;  %s1000_s9 = smov %s653_s10 }
  0x6d   : > { %p16_p8 = scmp.ge.s32.totalorder %s19_s14, 4   ;;  %s1001_s10 = smov %s657_s11 }
  0x6e   : > { %s1002_s11 = smov %s795_s27  ;;  %s1003_s12 = smov %s665_s13 }
  0x6f   : > { %s1004_s13 = smov %s1006_s28  ;;  %18 = sbr.rel (!%p16_p8) target bundleno = 7 (0x7), region = 78 }
  0x74   :  { %353 = vsyncpa [#allocation3], 1 }
  0x75   :  { %355 = vsyncpa [#allocation3 + $0x1], 1 }
  0x76   :  { %356 = vsyncpa [#allocation6], 1 }
  0x77   :  { %357 = vsyncpa [#allocation4], 1 }
  0x78   :  { %359 = vsyncpa [#allocation4 + $0x1], 1 }

</bundles_post_ra>
